<compile_context>
chip_gen: v7x
topology: tpu7x:2x2x1
jax: 0.10.0
libtpu: 0.0.40
codegen_flags: <defaults>
</compile_context>

<pallas_src>
import functools

import jax
import jax.numpy as jnp
import numpy as np
from jax.experimental import pallas as pl
from jax.experimental.pallas import tpu as pltpu


# ---------------------------------------------------------------------------
# Pallas kernel: fused conv3x3 + bias + LeakyReLU for a group of whole images
# ---------------------------------------------------------------------------
def _conv_leaky_relu_kernel(x_ref, w_ref, b_ref, o_ref, *, W, ml,
                            negative_slope):
    """x_ref: (nb, Cin, L)    VMEM  L = ml + H*W + mr (zero margins both ends)
       w_ref: (9, Cout, Cin)  VMEM  tap-major weight slab, tap = dy*3 + dx
       b_ref: (Cout, 1)       VMEM
       o_ref: (nb, Cout, HWp) VMEM  HWp = round_up(H*W, 128) -> lane-dense"""
    nb = x_ref.shape[0]
    hwp = o_ref.shape[2]

    # Column-boundary masks: the dx = -1/+1 taps of the flattened H*W axis
    # read across the image-row wrap; those lanes must contribute zero.
    col = jax.lax.broadcasted_iota(jnp.int32, (1, hwp), 1) % W
    not_left = col >= 1           # valid lanes for the dx = -1 taps
    not_right = col <= W - 2      # valid lanes for the dx = +1 taps

    bias = b_ref[...].astype(jnp.float32)                      # (Cout, 1)

    for b in range(nb):                                        # static unroll
        acc = None
        for t in range(9):
            oy, ox = t // 3 - 1, t % 3 - 1
            off = ml + oy * W + ox                             # static lane offset
            tap = x_ref[b, :, off:off + hwp]                   # (Cin, HWp)
            if ox == -1:
                tap = jnp.where(not_left, tap, jnp.zeros_like(tap))
            elif ox == 1:
                tap = jnp.where(not_right, tap, jnp.zeros_like(tap))
            part = jnp.dot(w_ref[t], tap,                      # (Cout, HWp) f32
                           preferred_element_type=jnp.float32)
            acc = part if acc is None else acc + part
        y = acc + bias
        y = jnp.where(y >= 0.0, y, negative_slope * y)         # LeakyReLU
        o_ref[b] = y.astype(o_ref.dtype)


# ---------------------------------------------------------------------------
# Tiling helpers
# ---------------------------------------------------------------------------
def _round_up(x, m):
    return (x + m - 1) // m * m


def _pick_batch_group(n, per_image_block_bytes, hwp, *, target_lanes=512,
                      vmem_budget=24 * 1024 * 1024):
    """Images per grid step: aim for >=512 lanes/step, but keep >=2 parallel
    grid steps (v7x megacore) when the batch allows, and stay inside a
    conservative double-buffered VMEM budget (safe on v7x's 64 MiB VMEM)."""
    best = 1
    for nb in range(1, n + 1):
        if n % nb:
            continue
        if 2 * nb * per_image_block_bytes > vmem_budget:   # 2x: double-buffered
            break
        if n >= 2 and n // nb < 2:                         # keep 2 parallel steps
            break
        best = nb
        if nb * hwp >= target_lanes:
            break
    return best


# ---------------------------------------------------------------------------
# Wrapper
# ---------------------------------------------------------------------------
def conv_leaky_relu2d(x_nchw, weight_oihw, bias, *, negative_slope=0.2,
                      use_bf16=False):
    """Conv2d(k=3, stride=1, pad=1, dilation=1, groups=1) + LeakyReLU. NCHW."""
    N, Cin, H, W = x_nchw.shape
    Cout = weight_oihw.shape[0]
    HW = H * W
    HWp = _round_up(HW, 128)          # lane-dense output extent
    ml = W + 1                        # left zero margin (covers dy = -1 taps)
    mr = W + 1 + (HWp - HW)           # right zero margin (dy = +1 taps + pad)
    L = ml + HW + mr

    in_dtype = jnp.bfloat16 if use_bf16 else x_nchw.dtype

    # Un-expanded input: cast (bf16 BEFORE any padding), flatten H*W (free,
    # contiguous), add the tiny zero margins.  No 9x im2col materialization.
    x_flat = x_nchw.astype(in_dtype).reshape(N, Cin, HW)
    x_flat = jnp.pad(x_flat, ((0, 0), (0, 0), (ml, mr)))

    # PyTorch OIHW weights -> tap-major slab (9, Cout, Cin), tap = dy*3 + dx.
    w_taps = jnp.transpose(weight_oihw, (2, 3, 0, 1)).reshape(9, Cout, Cin)
    w_taps = w_taps.astype(in_dtype)
    b_col = bias.reshape(Cout, 1).astype(jnp.float32)

    in_itemsize = jnp.dtype(in_dtype).itemsize
    out_itemsize = jnp.dtype(x_nchw.dtype).itemsize
    per_image_block_bytes = Cin * L * in_itemsize + Cout * HWp * out_itemsize
    nb = _pick_batch_group(N, per_image_block_bytes, HWp)
    grid = (N // nb,)

    cost = pl.CostEstimate(
        flops=2 * N * Cout * HW * 9 * Cin,
        transcendentals=0,
        bytes_accessed=(N * Cin * L * in_itemsize
                        + 9 * Cout * Cin * in_itemsize
                        + Cout * 4
                        + N * Cout * HWp * out_itemsize))

    kernel = functools.partial(_conv_leaky_relu_kernel, W=W, ml=ml,
                               negative_slope=negative_slope)
    out = pl.pallas_call(
        kernel,
        out_shape=jax.ShapeDtypeStruct((N, Cout, HWp), x_nchw.dtype),
        grid_spec=pltpu.PrefetchScalarGridSpec(
            num_scalar_prefetch=0,
            grid=grid,
            in_specs=[
                # un-expanded flat input: nb whole images per grid step.
                pl.BlockSpec((nb, Cin, L), lambda i: (i, 0, 0)),
                # weight slab + bias: constant block -> not re-DMA'd per step.
                pl.BlockSpec((9, Cout, Cin), lambda i: (0, 0, 0)),
                pl.BlockSpec((Cout, 1), lambda i: (0, 0)),
            ],
            out_specs=pl.BlockSpec((nb, Cout, HWp), lambda i: (i, 0, 0)),
        ),
        compiler_params=pltpu.CompilerParams(
            dimension_semantics=("parallel",),
            vmem_limit_bytes=32 * 1024 * 1024),
        cost_estimate=cost,
    )(x_flat, w_taps, b_col)

    if HWp != HW:
        out = out[:, :, :HW]
    return out.reshape(N, Cout, H, W)


# ---------------------------------------------------------------------------
# Pure-JAX reference (spec: F.leaky_relu(Conv2d(x), 0.2))
# ---------------------------------------------------------------------------
def reference_forward(x, w, b, negative_slope=0.2):
    y = jax.lax.conv_general_dilated(
        x, w, window_strides=(1, 1), padding=((1, 1), (1, 1)),
        dimension_numbers=("NCHW", "OIHW", "NCHW"))
    y = y + b.reshape(1, -1, 1, 1)
    return jnp.where(y >= 0.0, y, negative_slope * y)


# ---------------------------------------------------------------------------
if __name__ == "__main__":
    N, Cin, Cout, H, W = 2, 4, 32, 16, 16

    key = jax.random.PRNGKey(0)
    kx, kw, kb = jax.random.split(key, 3)
    x = jax.random.normal(kx, (N, Cin, H, W), jnp.float32)
    weight = jax.random.normal(kw, (Cout, Cin, 3, 3), jnp.float32) * 0.1
    bias = jax.random.normal(kb, (Cout,), jnp.float32) * 0.1

    # f32 path.
    fwd = jax.jit(functools.partial(conv_leaky_relu2d, negative_slope=0.2))
    out = jax.block_until_ready(fwd(x, weight, bias))
    assert out.shape == (N, Cout, H, W)

    ref = jax.block_until_ready(reference_forward(x, weight, bias))
    np.testing.assert_allclose(np.asarray(out), np.asarray(ref),
                               atol=2e-3, rtol=2e-3)

    # bf16 MXU path (f32 accumulation + epilogue; valid on v5e/v6e/v7x).
    fwd_bf16 = jax.jit(functools.partial(conv_leaky_relu2d, negative_slope=0.2,
                                         use_bf16=True))
    out_bf16 = jax.block_until_ready(fwd_bf16(x, weight, bias))
    ref_bf16 = jax.block_until_ready(reference_forward(
        x.astype(jnp.bfloat16).astype(jnp.float32),
        weight.astype(jnp.bfloat16).astype(jnp.float32), bias))
    np.testing.assert_allclose(np.asarray(out_bf16), np.asarray(ref_bf16),
                               atol=5e-2, rtol=5e-2)

    print("KERNEL_OK")
</pallas_src>

<mosaic_0001>
module attributes {stable_mosaic.version = 11 : i64} {
  func.func @_conv_leaky_relu_kernel(%arg0: i32, %arg1: memref<1x4x290xf32, #tpu.memory_space<vmem>>, %arg2: memref<9x32x4xf32, #tpu.memory_space<vmem>>, %arg3: memref<32x1xf32, #tpu.memory_space<vmem>>, %arg4: memref<1x32x256xf32, #tpu.memory_space<vmem>>) attributes {dimension_semantics = [#tpu.dimension_semantics<parallel>], iteration_bounds = array<i64: 2>, scalar_prefetch = 0 : i64, scratch_operands = 0 : i64, tpu.core_type = #tpu.core_type<tc>, window_params = [{transform_indices = @transform_0, window_bounds = array<i64: 1, 4, 290>}, {pipeline_mode = #tpu.pipeline_mode<synchronous>, transform_indices = @transform_1, window_bounds = array<i64: 9, 32, 4>}, {pipeline_mode = #tpu.pipeline_mode<synchronous>, transform_indices = @transform_2, window_bounds = array<i64: 32, 1>}, {transform_indices = @transform_3, window_bounds = array<i64: 1, 32, 256>}]} {
    %0 = tpu.iota {dimensions = array<i32: 1>} : vector<1x256xi32>
    %c16_i32 = arith.constant 16 : i32
    %c0_i32 = arith.constant 0 : i32
    %1 = arith.cmpi eq, %c16_i32, %c0_i32 : i32
    %c1_i32 = arith.constant 1 : i32
    %2 = arith.select %1, %c1_i32, %c16_i32 : i32
    %3 = vector.broadcast %2 : i32 to vector<1x256xi32>
    %4 = arith.remsi %0, %3 : vector<1x256xi32>
    %c0_i32_0 = arith.constant 0 : i32
    %5 = vector.broadcast %c0_i32_0 : i32 to vector<1x256xi32>
    %6 = arith.cmpi ne, %4, %5 : vector<1x256xi32>
    %c0_i32_1 = arith.constant 0 : i32
    %7 = vector.broadcast %c0_i32_1 : i32 to vector<1x256xi32>
    %8 = arith.cmpi slt, %4, %7 : vector<1x256xi32>
    %c0_i32_2 = arith.constant 0 : i32
    %9 = arith.cmpi slt, %2, %c0_i32_2 : i32
    %10 = vector.broadcast %9 : i1 to vector<1x256xi1>
    %11 = vector.broadcast %10 : vector<1x256xi1> to vector<1x256xi1>
    %12 = arith.xori %8, %11 : vector<1x256xi1>
    %13 = arith.andi %12, %6 : vector<1x256xi1>
    %14 = vector.broadcast %2 : i32 to vector<1x256xi32>
    %15 = arith.addi %4, %14 : vector<1x256xi32>
    %16 = arith.select %13, %15, %4 : vector<1x256xi1>, vector<1x256xi32>
    %c1_i32_3 = arith.constant 1 : i32
    %17 = vector.broadcast %c1_i32_3 : i32 to vector<1x256xi32>
    %18 = arith.cmpi sge, %16, %17 : vector<1x256xi32>
    %c14_i32 = arith.constant 14 : i32
    %19 = vector.broadcast %c14_i32 : i32 to vector<1x256xi32>
    %20 = arith.cmpi sle, %16, %19 : vector<1x256xi32>
    %c0 = arith.constant 0 : index
    %c0_4 = arith.constant 0 : index
    %21 = vector.load %arg3[%c0, %c0_4] : memref<32x1xf32, #tpu.memory_space<vmem>>, vector<32x1xf32>
    %c0_5 = arith.constant 0 : index
    %c0_6 = arith.constant 0 : index
    %c0_7 = arith.constant 0 : index
    %22 = vector.load %arg1[%c0_5, %c0_6, %c0_7] : memref<1x4x290xf32, #tpu.memory_space<vmem>>, vector<1x4x256xf32>
    %23 = vector.shape_cast %22 : vector<1x4x256xf32> to vector<4x256xf32>
    %cst = arith.constant 0.000000e+00 : f32
    %24 = vector.broadcast %cst : f32 to vector<4x256xf32>
    %25 = vector.shape_cast %18 : vector<1x256xi1> to vector<1x256xi1>
    %26 = vector.broadcast %25 : vector<1x256xi1> to vector<4x256xi1>
    %27 = arith.select %26, %23, %24 : vector<4x256xi1>, vector<4x256xf32>
    %c0_8 = arith.constant 0 : index
    %c0_9 = arith.constant 0 : index
    %c0_10 = arith.constant 0 : index
    %28 = vector.load %arg2[%c0_8, %c0_9, %c0_10] : memref<9x32x4xf32, #tpu.memory_space<vmem>>, vector<1x32x4xf32>
    %29 = vector.shape_cast %28 : vector<1x32x4xf32> to vector<32x4xf32>
    %cst_11 = arith.constant dense<0.000000e+00> : vector<32x256xf32>
    %30 = tpu.matmul %29, %27, %cst_11 {dimension_numbers = #tpu.dot_dimension_numbers<[1], [0], [0], [1], [0, 0, 1, 1], [], []>} : vector<32x4xf32>, vector<4x256xf32>, vector<32x256xf32> -> vector<32x256xf32>
    %c0_12 = arith.constant 0 : index
    %c0_13 = arith.constant 0 : index
    %c1 = arith.constant 1 : index
    %31 = vector.load %arg1[%c0_12, %c0_13, %c1] : memref<1x4x290xf32, #tpu.memory_space<vmem>>, vector<1x4x256xf32>
    %32 = vector.shape_cast %31 : vector<1x4x256xf32> to vector<4x256xf32>
    %c1_14 = arith.constant 1 : index
    %c0_15 = arith.constant 0 : index
    %c0_16 = arith.constant 0 : index
    %33 = vector.load %arg2[%c1_14, %c0_15, %c0_16] : memref<9x32x4xf32, #tpu.memory_space<vmem>>, vector<1x32x4xf32>
    %34 = vector.shape_cast %33 : vector<1x32x4xf32> to vector<32x4xf32>
    %cst_17 = arith.constant dense<0.000000e+00> : vector<32x256xf32>
    %35 = tpu.matmul %34, %32, %cst_17 {dimension_numbers = #tpu.dot_dimension_numbers<[1], [0], [0], [1], [0, 0, 1, 1], [], []>} : vector<32x4xf32>, vector<4x256xf32>, vector<32x256xf32> -> vector<32x256xf32>
    %36 = arith.addf %30, %35 : vector<32x256xf32>
    %c0_18 = arith.constant 0 : index
    %c0_19 = arith.constant 0 : index
    %c2 = arith.constant 2 : index
    %37 = vector.load %arg1[%c0_18, %c0_19, %c2] : memref<1x4x290xf32, #tpu.memory_space<vmem>>, vector<1x4x256xf32>
    %38 = vector.shape_cast %37 : vector<1x4x256xf32> to vector<4x256xf32>
    %cst_20 = arith.constant 0.000000e+00 : f32
    %39 = vector.broadcast %cst_20 : f32 to vector<4x256xf32>
    %40 = vector.shape_cast %20 : vector<1x256xi1> to vector<1x256xi1>
    %41 = vector.broadcast %40 : vector<1x256xi1> to vector<4x256xi1>
    %42 = arith.select %41, %38, %39 : vector<4x256xi1>, vector<4x256xf32>
    %c2_21 = arith.constant 2 : index
    %c0_22 = arith.constant 0 : index
    %c0_23 = arith.constant 0 : index
    %43 = vector.load %arg2[%c2_21, %c0_22, %c0_23] : memref<9x32x4xf32, #tpu.memory_space<vmem>>, vector<1x32x4xf32>
    %44 = vector.shape_cast %43 : vector<1x32x4xf32> to vector<32x4xf32>
    %cst_24 = arith.constant dense<0.000000e+00> : vector<32x256xf32>
    %45 = tpu.matmul %44, %42, %cst_24 {dimension_numbers = #tpu.dot_dimension_numbers<[1], [0], [0], [1], [0, 0, 1, 1], [], []>} : vector<32x4xf32>, vector<4x256xf32>, vector<32x256xf32> -> vector<32x256xf32>
    %46 = arith.addf %36, %45 : vector<32x256xf32>
    %c0_25 = arith.constant 0 : index
    %c0_26 = arith.constant 0 : index
    %c16 = arith.constant 16 : index
    %47 = vector.load %arg1[%c0_25, %c0_26, %c16] : memref<1x4x290xf32, #tpu.memory_space<vmem>>, vector<1x4x256xf32>
    %48 = vector.shape_cast %47 : vector<1x4x256xf32> to vector<4x256xf32>
    %cst_27 = arith.constant 0.000000e+00 : f32
    %49 = vector.broadcast %cst_27 : f32 to vector<4x256xf32>
    %50 = vector.shape_cast %18 : vector<1x256xi1> to vector<1x256xi1>
    %51 = vector.broadcast %50 : vector<1x256xi1> to vector<4x256xi1>
    %52 = arith.select %51, %48, %49 : vector<4x256xi1>, vector<4x256xf32>
    %c3 = arith.constant 3 : index
    %c0_28 = arith.constant 0 : index
    %c0_29 = arith.constant 0 : index
    %53 = vector.load %arg2[%c3, %c0_28, %c0_29] : memref<9x32x4xf32, #tpu.memory_space<vmem>>, vector<1x32x4xf32>
    %54 = vector.shape_cast %53 : vector<1x32x4xf32> to vector<32x4xf32>
    %cst_30 = arith.constant dense<0.000000e+00> : vector<32x256xf32>
    %55 = tpu.matmul %54, %52, %cst_30 {dimension_numbers = #tpu.dot_dimension_numbers<[1], [0], [0], [1], [0, 0, 1, 1], [], []>} : vector<32x4xf32>, vector<4x256xf32>, vector<32x256xf32> -> vector<32x256xf32>
    %56 = arith.addf %46, %55 : vector<32x256xf32>
    %c0_31 = arith.constant 0 : index
    %c0_32 = arith.constant 0 : index
    %c17 = arith.constant 17 : index
    %57 = vector.load %arg1[%c0_31, %c0_32, %c17] : memref<1x4x290xf32, #tpu.memory_space<vmem>>, vector<1x4x256xf32>
    %58 = vector.shape_cast %57 : vector<1x4x256xf32> to vector<4x256xf32>
    %c4 = arith.constant 4 : index
    %c0_33 = arith.constant 0 : index
    %c0_34 = arith.constant 0 : index
    %59 = vector.load %arg2[%c4, %c0_33, %c0_34] : memref<9x32x4xf32, #tpu.memory_space<vmem>>, vector<1x32x4xf32>
    %60 = vector.shape_cast %59 : vector<1x32x4xf32> to vector<32x4xf32>
    %cst_35 = arith.constant dense<0.000000e+00> : vector<32x256xf32>
    %61 = tpu.matmul %60, %58, %cst_35 {dimension_numbers = #tpu.dot_dimension_numbers<[1], [0], [0], [1], [0, 0, 1, 1], [], []>} : vector<32x4xf32>, vector<4x256xf32>, vector<32x256xf32> -> vector<32x256xf32>
    %62 = arith.addf %56, %61 : vector<32x256xf32>
    %c0_36 = arith.constant 0 : index
    %c0_37 = arith.constant 0 : index
    %c18 = arith.constant 18 : index
    %63 = vector.load %arg1[%c0_36, %c0_37, %c18] : memref<1x4x290xf32, #tpu.memory_space<vmem>>, vector<1x4x256xf32>
    %64 = vector.shape_cast %63 : vector<1x4x256xf32> to vector<4x256xf32>
    %cst_38 = arith.constant 0.000000e+00 : f32
    %65 = vector.broadcast %cst_38 : f32 to vector<4x256xf32>
    %66 = vector.shape_cast %20 : vector<1x256xi1> to vector<1x256xi1>
    %67 = vector.broadcast %66 : vector<1x256xi1> to vector<4x256xi1>
    %68 = arith.select %67, %64, %65 : vector<4x256xi1>, vector<4x256xf32>
    %c5 = arith.constant 5 : index
    %c0_39 = arith.constant 0 : index
    %c0_40 = arith.constant 0 : index
    %69 = vector.load %arg2[%c5, %c0_39, %c0_40] : memref<9x32x4xf32, #tpu.memory_space<vmem>>, vector<1x32x4xf32>
    %70 = vector.shape_cast %69 : vector<1x32x4xf32> to vector<32x4xf32>
    %cst_41 = arith.constant dense<0.000000e+00> : vector<32x256xf32>
    %71 = tpu.matmul %70, %68, %cst_41 {dimension_numbers = #tpu.dot_dimension_numbers<[1], [0], [0], [1], [0, 0, 1, 1], [], []>} : vector<32x4xf32>, vector<4x256xf32>, vector<32x256xf32> -> vector<32x256xf32>
    %72 = arith.addf %62, %71 : vector<32x256xf32>
    %c0_42 = arith.constant 0 : index
    %c0_43 = arith.constant 0 : index
    %c32 = arith.constant 32 : index
    %73 = vector.load %arg1[%c0_42, %c0_43, %c32] : memref<1x4x290xf32, #tpu.memory_space<vmem>>, vector<1x4x256xf32>
    %74 = vector.shape_cast %73 : vector<1x4x256xf32> to vector<4x256xf32>
    %cst_44 = arith.constant 0.000000e+00 : f32
    %75 = vector.broadcast %cst_44 : f32 to vector<4x256xf32>
    %76 = vector.shape_cast %18 : vector<1x256xi1> to vector<1x256xi1>
    %77 = vector.broadcast %76 : vector<1x256xi1> to vector<4x256xi1>
    %78 = arith.select %77, %74, %75 : vector<4x256xi1>, vector<4x256xf32>
    %c6 = arith.constant 6 : index
    %c0_45 = arith.constant 0 : index
    %c0_46 = arith.constant 0 : index
    %79 = vector.load %arg2[%c6, %c0_45, %c0_46] : memref<9x32x4xf32, #tpu.memory_space<vmem>>, vector<1x32x4xf32>
    %80 = vector.shape_cast %79 : vector<1x32x4xf32> to vector<32x4xf32>
    %cst_47 = arith.constant dense<0.000000e+00> : vector<32x256xf32>
    %81 = tpu.matmul %80, %78, %cst_47 {dimension_numbers = #tpu.dot_dimension_numbers<[1], [0], [0], [1], [0, 0, 1, 1], [], []>} : vector<32x4xf32>, vector<4x256xf32>, vector<32x256xf32> -> vector<32x256xf32>
    %82 = arith.addf %72, %81 : vector<32x256xf32>
    %c0_48 = arith.constant 0 : index
    %c0_49 = arith.constant 0 : index
    %c33 = arith.constant 33 : index
    %83 = vector.load %arg1[%c0_48, %c0_49, %c33] : memref<1x4x290xf32, #tpu.memory_space<vmem>>, vector<1x4x256xf32>
    %84 = vector.shape_cast %83 : vector<1x4x256xf32> to vector<4x256xf32>
    %c7 = arith.constant 7 : index
    %c0_50 = arith.constant 0 : index
    %c0_51 = arith.constant 0 : index
    %85 = vector.load %arg2[%c7, %c0_50, %c0_51] : memref<9x32x4xf32, #tpu.memory_space<vmem>>, vector<1x32x4xf32>
    %86 = vector.shape_cast %85 : vector<1x32x4xf32> to vector<32x4xf32>
    %cst_52 = arith.constant dense<0.000000e+00> : vector<32x256xf32>
    %87 = tpu.matmul %86, %84, %cst_52 {dimension_numbers = #tpu.dot_dimension_numbers<[1], [0], [0], [1], [0, 0, 1, 1], [], []>} : vector<32x4xf32>, vector<4x256xf32>, vector<32x256xf32> -> vector<32x256xf32>
    %88 = arith.addf %82, %87 : vector<32x256xf32>
    %c0_53 = arith.constant 0 : index
    %c0_54 = arith.constant 0 : index
    %c34 = arith.constant 34 : index
    %89 = vector.load %arg1[%c0_53, %c0_54, %c34] : memref<1x4x290xf32, #tpu.memory_space<vmem>>, vector<1x4x256xf32>
    %90 = vector.shape_cast %89 : vector<1x4x256xf32> to vector<4x256xf32>
    %cst_55 = arith.constant 0.000000e+00 : f32
    %91 = vector.broadcast %cst_55 : f32 to vector<4x256xf32>
    %92 = vector.shape_cast %20 : vector<1x256xi1> to vector<1x256xi1>
    %93 = vector.broadcast %92 : vector<1x256xi1> to vector<4x256xi1>
    %94 = arith.select %93, %90, %91 : vector<4x256xi1>, vector<4x256xf32>
    %c8 = arith.constant 8 : index
    %c0_56 = arith.constant 0 : index
    %c0_57 = arith.constant 0 : index
    %95 = vector.load %arg2[%c8, %c0_56, %c0_57] : memref<9x32x4xf32, #tpu.memory_space<vmem>>, vector<1x32x4xf32>
    %96 = vector.shape_cast %95 : vector<1x32x4xf32> to vector<32x4xf32>
    %cst_58 = arith.constant dense<0.000000e+00> : vector<32x256xf32>
    %97 = tpu.matmul %96, %94, %cst_58 {dimension_numbers = #tpu.dot_dimension_numbers<[1], [0], [0], [1], [0, 0, 1, 1], [], []>} : vector<32x4xf32>, vector<4x256xf32>, vector<32x256xf32> -> vector<32x256xf32>
    %98 = arith.addf %88, %97 : vector<32x256xf32>
    %99 = vector.broadcast %21 : vector<32x1xf32> to vector<32x256xf32>
    %100 = arith.addf %98, %99 : vector<32x256xf32>
    %cst_59 = arith.constant 0.000000e+00 : f32
    %101 = vector.broadcast %cst_59 : f32 to vector<32x256xf32>
    %102 = arith.cmpf oge, %100, %101 : vector<32x256xf32>
    %cst_60 = arith.constant 2.000000e-01 : f32
    %103 = vector.broadcast %cst_60 : f32 to vector<32x256xf32>
    %104 = arith.mulf %103, %100 : vector<32x256xf32>
    %105 = arith.select %102, %100, %104 : vector<32x256xi1>, vector<32x256xf32>
    %c0_61 = arith.constant 0 : index
    %c0_62 = arith.constant 0 : index
    %c0_63 = arith.constant 0 : index
    %106 = vector.load %arg4[%c0_61, %c0_62, %c0_63] : memref<1x32x256xf32, #tpu.memory_space<vmem>>, vector<1x32x256xf32>
    %107 = vector.shape_cast %106 : vector<1x32x256xf32> to vector<32x256xf32>
    %108 = vector.shape_cast %105 : vector<32x256xf32> to vector<1x32x256xf32>
    tpu.vector_store %arg4[%c0_61, %c0_62, %c0_63], %108 {strides = array<i32>} : memref<1x32x256xf32, #tpu.memory_space<vmem>>, vector<1x32x256xf32>,
    return
  }
  func.func @transform_0(%arg0: i32) -> (i32, i32, i32) {
    %c0_i32 = arith.constant 0 : i32
    %c0_i32_0 = arith.constant 0 : i32
    %c0_i32_1 = arith.constant 0 : i32
    return %arg0, %c0_i32, %c0_i32_0 : i32, i32, i32
  }
  func.func @transform_1(%arg0: i32) -> (i32, i32, i32) {
    %c0_i32 = arith.constant 0 : i32
    %c0_i32_0 = arith.constant 0 : i32
    %c0_i32_1 = arith.constant 0 : i32
    %c0_i32_2 = arith.constant 0 : i32
    return %c0_i32, %c0_i32_0, %c0_i32_1 : i32, i32, i32
  }
  func.func @transform_2(%arg0: i32) -> (i32, i32) {
    %c0_i32 = arith.constant 0 : i32
    %c0_i32_0 = arith.constant 0 : i32
    %c0_i32_1 = arith.constant 0 : i32
    return %c0_i32, %c0_i32_0 : i32, i32
  }
  func.func @transform_3(%arg0: i32) -> (i32, i32, i32) {
    %c0_i32 = arith.constant 0 : i32
    %c0_i32_0 = arith.constant 0 : i32
    %c0_i32_1 = arith.constant 0 : i32
    return %arg0, %c0_i32, %c0_i32_0 : i32, i32, i32
  }
}

</mosaic_0001>

<bundles_post_ra>
// kernel: conv_leaky_relu2d.1
= control target key start
LH: loop header
LB: loop body
LE: loop exit
PB: predicated region body
PF: predicated region fallthrough
CT: control target
= control target key end

     0   :  { %s1746_s12 = smov 0   ;;  %s2082_s0 = inlined_call_operand.vmem [shape: f32[2,4,290], index: 0, kind: input, shape index: {}]   ;;  %s2083_s1 = inlined_call_operand.vmem [shape: f32[9,32,4], index: 1, kind: input, shape index: {}]   ;;  %s2084_s2 = inlined_call_operand.vmem [shape: f32[32,1], index: 2, kind: input, shape index: {}]   ;;  %s2085_s3 = inlined_call_operand.vmem [shape: f32[2,32,256], index: 3, kind: output, shape index: {}]  }
   0x1 LB: > { %s1523_s13 = sadd.s32 4294967295, %s1714_s12   ;;  %p1527_p0 = scmp.ge.s32.totalorder %s1714_s12, 1  ;;  %s1714_s12 = sphi %s1746_s12, %s13_s12  }
   0x2   : > { %p137_p1 = scmp.lt.s32.totalorder %s1714_s12, 3 }
   0x4   : > { %p138_p2 = pnand %p1527_p0, %p137_p1 }
   0x5   : > { %p161_p3 = scmp.lt.s32.totalorder (!%p138_p2), %s1523_s13, 1  ;;  %v1716_v0 = vmov (!%p138_p2), 0.0   ;;  %s1717_s18 = smov (!%p138_p2), 111   ;;  %v202_v11 = vld [vmem:[%s2084_s2] sm:$0xff] (!%p138_p2)  ;;  %v203_v12 = vld [vmem:[%s2084_s2 + $0x8] sm:$0xff] (!%p138_p2)  ;;  %v1725_v13 = vmov (!%p138_p2), 0   ;;  %v171_v16 = vlaneseq (!%p138_p2) }
   0x6   : > { %141 = sbr.rel (%p138_p2) target bundleno = 434 (0x1b2), region = 32  ;;  %318 = vmatprep.mubr.f32.mxu1 (!%p138_p2), %v1716_v0  ;;  %829 = vmatprep.mubr.f32.mxu0 (!%p138_p2), %v1716_v0  ;;  %s1718_s19 = smov (!%p138_p2), 127   ;;  %v204_v14 = vld [vmem:[%s2084_s2 + $0x10] sm:$0xff] (!%p138_p2)  ;;  %v205_v15 = vld [vmem:[%s2084_s2 + $0x18] sm:$0xff] (!%p138_p2)  ;;  %vm746_vm0 = vcmask (!%p138_p2), 908288   ;;  %vm249_vm1 = vcmask (!%p138_p2), 1043456  }
   0x7   : > { %s1719_s20 = smov (!%p138_p2), 110   ;;  %s1720_s21 = smov (!%p138_p2), 96   ;;  %1705 = vset.pattern.permute.xlu0 (!%p138_p2), %v1725_v13  ;;  %1706 = vset.pattern.permute.xlu1 (!%p138_p2), %v1725_v13  ;;  %v172_v17 = vand.u32 (!%p138_p2), 127, %v171_v16  ;;  %vm233_vm2 = vcmask (!%p138_p2), 1039360   ;;  %vm236_vm5 = vcmask (!%p138_p2), 31744   ;;  %v1567_v30 = vld [vmem:[%s2083_s1 + $0x80] sm:$0xff] (!%p138_p2) }
   0x8   : > { %s1721_s22 = smov (!%p138_p2), 126   ;;  %s1722_s23 = smov (!%p138_p2), 95   ;;  %v1531_v34 = vld [vmem:[%s2083_s1 + $0x20] sm:$0xff] (!%p138_p2)  ;;  %vm873_vm6 = vcmask (!%p138_p2), 900096   ;;  %v1568_v40 = vld [vmem:[%s2083_s1 + $0x88] sm:$0xff] (!%p138_p2)  ;;  %v1533_v48 = vld [vmem:[%s2083_s1 + $0x30] sm:$0xff] (!%p138_p2) }
   0x9   : > { %s1723_s24 = smov (!%p138_p2), 112   ;;  %s1724_s25 = smov (!%p138_p2), 94   ;;  %v173_v20 = vadd.s32 (!%p138_p2), 128, %v172_v17  ;;  %v178_v25 = vand.u32 (!%p138_p2), 15, %v172_v17  ;;  %v1532_v42 = vld [vmem:[%s2083_s1 + $0x28] sm:$0xff] (!%p138_p2)  ;;  %v1577_v49 = vld [vmem:[%s2083_s1 + $0xa0] sm:$0xff] (!%p138_p2) }
   0xa   : > { %vm1011_vm9 = vcmask (!%p138_p2), 785408   ;;  %v1534_v55 = vld [vmem:[%s2083_s1 + $0x38] sm:$0xff] (!%p138_p2)  ;;  %v1578_v56 = vld [vmem:[%s2083_s1 + $0xa8] sm:$0xff] (!%p138_p2)  ;;  %vm465_vm10 = vcmask (!%p138_p2), 1031168   ;;  %v1579_v62 = vld [vmem:[%s2083_s1 + $0xb0] sm:$0xff] (!%p138_p2)  ;;  %vm1154_vm11 = vcmask (!%p138_p2), 777216  }
   0xb   : > { %v185_v24 = vand.u32 (!%p138_p2), 15, %v173_v20  ;;  %vm1816_vm4 = vcmp.ge.s32.totalorder (!%p138_p2), %v178_v25, 1  ;;  %vm1860_vm8 = vcmp.le.s32.totalorder (!%p138_p2), %v178_v25, 14  ;;  %v216_v63 = vld [vmem:[%s2083_s1] sm:$0xff] (!%p138_p2)  ;;  %vm603_vm12 = vcmask (!%p138_p2), 916480   ;;  %v219_v17 = vld [vmem:[%s2083_s1 + $0x18] sm:$0xff] (!%p138_p2) }
   0xc   : > { %v1589_v25 = vld [vmem:[%s2083_s1 + $0xd0] sm:$0xff] (!%p138_p2)  ;;  %vm1281_vm13 = vcmask (!%p138_p2), 769024   ;;  %v1550_v37 = vld [vmem:[%s2083_s1 + $0x58] sm:$0xff] (!%p138_p2) }
   0xd   : > { %s2095_s13 = smov (!%p161_p3, %s1523_s13), 1  ;;  %vm1812_vm3 = vcmp.ge.s32.totalorder %v185_v24, 1  ;;  %vm1840_vm7 = vcmp.le.s32.totalorder %v185_v24, 14  ;;  %v1547_v24 = vld [vmem:[%s2083_s1 + $0x40] sm:$0xff]  ;;  %v1560_v44 = vld [vmem:[%s2083_s1 + $0x78] sm:$0xff] }
   0xe   : > { %s1686_s14 = smul.u32 12, %s2095_s13  ;;  %s1619_s4 = sshll.u32 %s2095_s13, 6 }
   0xf   : > { %s2069_s7 = scalar_lea.vmem %s2085_s3, %s1619_s4 }
  0x10   : > { %s1762_s17 = scalar_lea.vmem %s2082_s0, %s1686_s14 }
  0x11   : > { %v731_v1 = vld [vmem:[%s1762_s17 + $0x8] sm:$0xf]  ;;  %v1767_v3 = vld [vmem:[%s1762_s17] sm:$0xff] }
  0x12   : > { %v220_v2 = vld [vmem:[%s1762_s17 + $0x8] sm:$0xf]  ;;  %744 = vrot.lane.b32.xlu1 %v731_v1, %s1717_s18  ;;  %v1771_v4 = vcombine.high %v1767_v3, %v1767_v3  ;;  %v214_v36 = vsel %vm1816_vm4, %v1767_v3, 0.0 }
  0x13   : > { %231 = vrot.lane.b32.xlu0 %v220_v2, %s1718_s19  ;;  %v863_v5 = vld [vmem:[%s1762_s17 + $0x8] sm:$0xf] }
  0x14   : > { %v1001_v6 = vld [vmem:[%s1762_s17 + $0x8] sm:$0xf]  ;;  %v215_v35 = vsel %vm1812_vm3, %v1771_v4, 0.0 }
  0x15   : > { %v451_v7 = vld [vmem:[%s1762_s17 + $0x8] sm:$0xf] }
  0x16   : > { %742 = vrot.lane.b32.xlu1 %v1771_v4, %s1717_s18  ;;  %v1139_v8 = vld [vmem:[%s1762_s17 + $0x8] sm:$0xf] }
  0x17   : > { %227 = vrot.lane.b32.xlu0 %v1767_v3, %s1718_s19  ;;  %v593_v9 = vld [vmem:[%s1762_s17 + $0x8] sm:$0xf] }
  0x18   : > { %v1271_v10 = vld [vmem:[%s1762_s17 + $0x8] sm:$0xf] }
  0x1a   : > { %740 = vrot.lane.b32.xlu1 %v1767_v3, %s1717_s18 }
  0x1b   : > { %229 = vrot.lane.b32.xlu0 %v1771_v4, %s1718_s19 }
  0x1e   : > { %871 = vrot.lane.b32.xlu1 %v863_v5, %s1719_s20  ;;  %v217_v5 = vld [vmem:[%s2083_s1 + $0x8] sm:$0xff] }
  0x1f   : > { %869 = vrot.lane.b32.xlu0 %v1771_v4, %s1719_s20 }
  0x22   : > { %1007 = vrot.lane.b32.xlu1 %v1771_v4, %s1720_s21 }
  0x23   : > { %867 = vrot.lane.b32.xlu0 %v1767_v3, %s1719_s20 }
  0x26   : > { %1005 = vrot.lane.b32.xlu1 %v1767_v3, %s1720_s21 }
  0x27   : > { %1009 = vrot.lane.b32.xlu0 %v1001_v6, %s1720_s21  ;;  %v1580_v6 = vld [vmem:[%s2083_s1 + $0xb8] sm:$0xff] }
  0x2a   : > { %463 = vrot.lane.b32.xlu1 %v451_v7, %s1721_s22 }
  0x2b   : > { %461 = vrot.lane.b32.xlu0 %v1771_v4, %s1721_s22 }
  0x2e   : > { %1150 = vrot.lane.b32.xlu1 %v1771_v4, %s1722_s23 }
  0x2f   : > { %459 = vrot.lane.b32.xlu0 %v1767_v3, %s1721_s22 }
  0x32   : > { %1148 = vrot.lane.b32.xlu1 %v1767_v3, %s1722_s23 }
  0x33   : > { %1152 = vrot.lane.b32.xlu0 %v1139_v8, %s1722_s23 }
  0x36   : > { %601 = vrot.lane.b32.xlu1 %v593_v9, %s1723_s24 }
  0x37   : > { %599 = vrot.lane.b32.xlu0 %v1771_v4, %s1723_s24 }
  0x3a   : > { %1277 = vrot.lane.b32.xlu1 %v1771_v4, %s1724_s25 }
  0x3b   : > { %597 = vrot.lane.b32.xlu0 %v1767_v3, %s1723_s24 }
  0x3e   : > { %1275 = vrot.lane.b32.xlu1 %v1767_v3, %s1724_s25 }
  0x3f   : > { %1279 = vrot.lane.b32.xlu0 %v1271_v10, %s1724_s25 }
  0x42   : > { %1415 = vperm.xlu1 %1706, %v203_v12   ;;  %v1587_v12 = vld [vmem:[%s2083_s1 + $0xc0] sm:$0xff] }
  0x43   : > { %1410 = vperm.xlu0 %1705, %v202_v11   ;;  %v218_v11 = vld [vmem:[%s2083_s1 + $0x10] sm:$0xff] }
  0x46   : > { %1420 = vperm.xlu1 %1706, %v204_v14  }
  0x47   : > { %1425 = vperm.xlu0 %1705, %v205_v15  }
  0x84   : > { %v745_v18 = vpop.permute.xlu1 %744 }
  0x85   : > { %v232_v19 = vpop.permute.xlu0 %231 }
  0x88   : > { %v743_v21 = vpop.permute.xlu1 %742 }
  0x89   : > { %v228_v22 = vpop.permute.xlu0 %227  ;;  %v1808_v23 = vsel %vm746_vm0, %v743_v21, %v745_v18  ;;  %v1588_v18 = vld [vmem:[%s2083_s1 + $0xc8] sm:$0xff] }
  0x8a   : > { %1571 = vmatprep.subr.msk.mxu0 %vm249_vm1, %v1808_v23 }
  0x8c   : > { %v741_v28 = vpop.permute.xlu1 %740 }
  0x8d   : > { %v230_v29 = vpop.permute.xlu0 %229  ;;  %v1824_v32 = vsel %vm746_vm0, %v741_v28, %v743_v21 }
  0x8e   : > { %v235_v31 = vsel %vm233_vm2, %v230_v29, %v232_v19  ;;  %v234_v33 = vsel %vm233_vm2, %v228_v22, %v230_v29  ;;  %1572 = vmatpush1.msk.msra.mxu0 %vm249_vm1, %v1824_v32  ;;  %v1548_v29 = vld [vmem:[%s2083_s1 + $0x48] sm:$0xff] }
  0x8f   : > { %1535 = vmatprep.subr.msk.mxu1 %vm249_vm1, %v235_v31  ;;  %1573 = vmatmul.mubr.msk.f32.vlgmr.msra.gmra.mrb[0].mxu0 %vm236_vm5, %v1567_v30  ;;  %v1590_v30 = vld [vmem:[%s2083_s1 + $0xd8] sm:$0xff] }
  0x90   : > { %1536 = vmatpush1.msk.msra.mxu1 %vm249_vm1, %v234_v33  ;;  %v872_v38 = vpop.permute.xlu1 %871  ;;  %835 = vmatprep.mubr.f32.mxu0 %v1716_v0 }
  0x91   : > { %1537 = vmatmul.mubr.msk.f32.vlgmr.msra.gmra.mrb[0].mxu1 %vm236_vm5, %v1531_v34  ;;  %v870_v39 = vpop.permute.xlu0 %869  ;;  %1541 = vmatprep.subr.msk.mxu1 %vm249_vm1, %v215_v35  ;;  %v1597_v35 = vld [vmem:[%s2083_s1 + $0xe0] sm:$0xff] }
  0x92   : > { %v875_v41 = vsel %vm873_vm6, %v870_v39, %v872_v38  ;;  %324 = vmatprep.mubr.f32.mxu1 %v1716_v0  ;;  %1542 = vmatpush1.msk.msra.mxu1 %vm249_vm1, %v214_v36  ;;  %v1598_v38 = vld [vmem:[%s2083_s1 + $0xe8] sm:$0xff] }
  0x93   : > { %v879_v43 = vsel %vm1840_vm7, %v875_v41, 0.0  ;;  %1574 = vmatmul.mubr.msk.f32.gmra.mrb[2].mxu0 %vm236_vm5, %v1568_v40  ;;  %v1599_v40 = vld [vmem:[%s2083_s1 + $0xf0] sm:$0xff]  ;;  %v1558_v41 = vld [vmem:[%s2083_s1 + $0x68] sm:$0xff] }
  0x94   : > { %1581 = vmatprep.subr.msk.mxu0 %vm249_vm1, %v879_v43  ;;  %v1008_v45 = vpop.permute.xlu1 %1007  ;;  %967 = vmatprep.mubr.f32.mxu0 %v1716_v0  ;;  %v1607_v43 = vld [vmem:[%s2083_s1 + $0x100] sm:$0xff] }
  0x95   : > { %1538 = vmatmul.mubr.msk.f32.gmra.mrb[2].mxu1 %vm236_vm5, %v1532_v42  ;;  %v868_v46 = vpop.permute.xlu0 %867  ;;  %v1600_v42 = vld [vmem:[%s2083_s1 + $0xf8] sm:$0xff] }
  0x96   : > { %v874_v47 = vsel %vm873_vm6, %v868_v46, %v870_v39  ;;  %330 = vmatprep.mubr.f32.mxu1 %v1716_v0  ;;  %v1557_v39 = vld [vmem:[%s2083_s1 + $0x60] sm:$0xff]  ;;  %v1569_v46 = vld [vmem:[%s2083_s1 + $0x90] sm:$0xff] }
  0x97   : > { %v878_v50 = vsel %vm1860_vm8, %v874_v47, 0.0  ;;  %v1609_v47 = vld [vmem:[%s2083_s1 + $0x110] sm:$0xff] }
  0x98   : > { %1582 = vmatpush1.msk.msra.mxu0 %vm249_vm1, %v878_v50  ;;  %v1006_v51 = vpop.permute.xlu1 %1005 }
  0x99   : > { %1539 = vmatmul.mubr.msk.f32.gmra.mrb[4].mxu1 %vm236_vm5, %v1533_v48  ;;  %1583 = vmatmul.mubr.msk.f32.vlgmr.msra.gmra.mrb[0].mxu0 %vm236_vm5, %v1577_v49  ;;  %v1010_v52 = vpop.permute.xlu0 %1009  ;;  %v1012_v53 = vsel %vm1011_vm9, %v1006_v51, %v1008_v45  ;;  %v1570_v48 = vld [vmem:[%s2083_s1 + $0x98] sm:$0xff] }
  0x9a   : > { %v1013_v54 = vsel %vm1011_vm9, %v1008_v45, %v1010_v52  ;;  %336 = vmatprep.mubr.f32.mxu1 %v1716_v0  ;;  %973 = vmatprep.mubr.f32.mxu0 %v1716_v0  ;;  %v1016_v57 = vsel %vm1816_vm4, %v1012_v53, 0.0  ;;  %v1608_v45 = vld [vmem:[%s2083_s1 + $0x108] sm:$0xff]  ;;  %v1610_v49 = vld [vmem:[%s2083_s1 + $0x118] sm:$0xff] }
  0x9b   : > { %v1017_v58 = vsel %vm1812_vm3, %v1013_v54, 0.0 }
  0x9c   : > { %1591 = vmatprep.subr.msk.mxu0 %vm249_vm1, %v1017_v58  ;;  %v464_v60 = vpop.permute.xlu1 %463 }
  0x9d   : > { %1540 = vmatmul.mubr.msk.f32.gmra.mrb[6].mxu1 %vm236_vm5, %v1534_v55  ;;  %1584 = vmatmul.mubr.msk.f32.gmra.mrb[2].mxu0 %vm236_vm5, %v1578_v56  ;;  %v462_v59 = vpop.permute.xlu0 %461 }
  0x9e   : > { %1592 = vmatpush1.msk.msra.mxu0 %vm249_vm1, %v1016_v57  ;;  %v467_v61 = vsel %vm465_vm10, %v462_v59, %v464_v60  ;;  %425 = vmatprep.mubr.f32.mxu1 %v1716_v0 }
  0x9f   : > { %v471_v1 = vsel %vm1840_vm7, %v467_v61, 0.0  ;;  %979 = vmatprep.mubr.f32.mxu0 %v1716_v0 }
  0xa0   : > { %1551 = vmatprep.subr.msk.mxu1 %vm249_vm1, %v471_v1  ;;  %v1151_v3 = vpop.permute.xlu1 %1150 }
  0xa1   : > { %1585 = vmatmul.mubr.msk.f32.gmra.mrb[4].mxu0 %vm236_vm5, %v1579_v62  ;;  %v460_v2 = vpop.permute.xlu0 %459  ;;  %1543 = vmatmul.mubr.msk.f32.vlgmr.msra.gmra.mrb[0].mxu1 %vm236_vm5, %v216_v63 }
  0xa2   : > { %v466_v4 = vsel %vm465_vm10, %v460_v2, %v462_v59  ;;  %431 = vmatprep.mubr.f32.mxu1 %v1716_v0  ;;  %985 = vmatprep.mubr.f32.mxu0 %v1716_v0 }
  0xa3   : > { %v470_v7 = vsel %vm1860_vm8, %v466_v4, 0.0 }
  0xa4   : > { %1552 = vmatpush1.msk.msra.mxu1 %vm249_vm1, %v470_v7  ;;  %v1149_v9 = vpop.permute.xlu1 %1148 }
  0xa5   : > { %1544 = vmatmul.mubr.msk.f32.gmra.mrb[2].mxu1 %vm236_vm5, %v217_v5  ;;  %1586 = vmatmul.mubr.msk.f32.gmra.mrb[6].mxu0 %vm236_vm5, %v1580_v6  ;;  %v1153_v8 = vpop.permute.xlu0 %1152  ;;  %v1155_v13 = vsel %vm1154_vm11, %v1149_v9, %v1151_v3 }
  0xa6   : > { %v1156_v10 = vsel %vm1154_vm11, %v1151_v3, %v1153_v8  ;;  %437 = vmatprep.mubr.f32.mxu1 %v1716_v0  ;;  %1105 = vmatprep.mubr.f32.mxu0 %v1716_v0 }
  0xa7   : > { %1601 = vmatprep.subr.msk.mxu0 %vm249_vm1, %v1156_v10 }
  0xa8   : > { %v602_v15 = vpop.permute.xlu1 %601 }
  0xa9   : > { %1545 = vmatmul.mubr.msk.f32.gmra.mrb[4].mxu1 %vm236_vm5, %v218_v11  ;;  %1593 = vmatmul.mubr.msk.f32.vlgmr.msra.gmra.mrb[0].mxu0 %vm236_vm5, %v1587_v12  ;;  %v600_v14 = vpop.permute.xlu0 %599 }
  0xaa   : > { %443 = vmatprep.mubr.f32.mxu1 %v1716_v0  ;;  %1111 = vmatprep.mubr.f32.mxu0 %v1716_v0  ;;  %v605_v16 = vsel %vm603_vm12, %v600_v14, %v602_v15 }
  0xab   : > { %1602 = vmatpush1.msk.msra.mxu0 %vm249_vm1, %v1155_v13  ;;  %v609_v19 = vsel %vm1812_vm3, %v605_v16, 0.0 }
  0xac   : > { %1561 = vmatprep.subr.msk.mxu1 %vm249_vm1, %v609_v19  ;;  %v1278_v21 = vpop.permute.xlu1 %1277 }
  0xad   : > { %1546 = vmatmul.mubr.msk.f32.gmra.mrb[6].mxu1 %vm236_vm5, %v219_v17  ;;  %1594 = vmatmul.mubr.msk.f32.gmra.mrb[2].mxu0 %vm236_vm5, %v1588_v18  ;;  %v598_v20 = vpop.permute.xlu0 %597 }
  0xae   : > { %v604_v22 = vsel %vm603_vm12, %v598_v20, %v600_v14  ;;  %559 = vmatprep.mubr.f32.mxu1 %v1716_v0  ;;  %1117 = vmatprep.mubr.f32.mxu0 %v1716_v0 }
  0xaf   : > { %v608_v26 = vsel %vm1816_vm4, %v604_v22, 0.0 }
  0xb0   : > { %v1276_v31 = vpop.permute.xlu1 %1275 }
  0xb1   : > { %1553 = vmatmul.mubr.msk.f32.vlgmr.msra.gmra.mrb[0].mxu1 %vm236_vm5, %v1547_v24  ;;  %1595 = vmatmul.mubr.msk.f32.gmra.mrb[4].mxu0 %vm236_vm5, %v1589_v25  ;;  %v1280_v28 = vpop.permute.xlu0 %1279  ;;  %v1282_v34 = vsel %vm1281_vm13, %v1276_v31, %v1278_v21 }
  0xb2   : > { %1562 = vmatpush1.msk.msra.mxu1 %vm249_vm1, %v608_v26  ;;  %565 = vmatprep.mubr.f32.mxu1 %v1716_v0  ;;  %v1283_v27 = vsel %vm1281_vm13, %v1278_v21, %v1280_v28  ;;  %v1286_v36 = vsel %vm1860_vm8, %v1282_v34, 0.0 }
  0xb3   : > { %1620 = vmatprep.subr.msk.mxu1 %vm249_vm1, %v1808_v23  ;;  %1123 = vmatprep.mubr.f32.mxu0 %v1716_v0  ;;  %v1287_v33 = vsel %vm1840_vm7, %v1283_v27, 0.0  ;;  %v1549_v23 = vld [vmem:[%s2083_s1 + $0x50] sm:$0xff] }
  0xb4   : > { %1611 = vmatprep.subr.msk.mxu0 %vm249_vm1, %v1287_v33 }
  0xb5   : > { %1554 = vmatmul.mubr.msk.f32.gmra.mrb[2].mxu1 %vm236_vm5, %v1548_v29  ;;  %1596 = vmatmul.mubr.msk.f32.gmra.mrb[6].mxu0 %vm236_vm5, %v1590_v30 }
  0xb6   : > { %1237 = vmatprep.mubr.f32.mxu0 %v1716_v0  ;;  %571 = vmatprep.mubr.f32.mxu1 %v1716_v0 }
  0xb9   : > { %1555 = vmatmul.mubr.msk.f32.gmra.mrb[4].mxu1 %vm236_vm5, %v1549_v23  ;;  %1603 = vmatmul.mubr.msk.f32.vlgmr.msra.gmra.mrb[0].mxu0 %vm236_vm5, %v1597_v35 }
  0xba   : > { %577 = vmatprep.mubr.f32.mxu1 %v1716_v0  ;;  %1243 = vmatprep.mubr.f32.mxu0 %v1716_v0 }
  0xbb   : > { %1612 = vmatpush1.msk.msra.mxu0 %vm249_vm1, %v1286_v36 }
  0xbd   : > { %1556 = vmatmul.mubr.msk.f32.gmra.mrb[6].mxu1 %vm236_vm5, %v1550_v37  ;;  %1604 = vmatmul.mubr.msk.f32.gmra.mrb[2].mxu0 %vm236_vm5, %v1598_v38 }
  0xbe   : > { %697 = vmatprep.mubr.f32.mxu1 %v1716_v0  ;;  %1249 = vmatprep.mubr.f32.mxu0 %v1716_v0 }
  0xc1   : > { %1563 = vmatmul.mubr.msk.f32.vlgmr.msra.gmra.mrb[0].mxu1 %vm236_vm5, %v1557_v39  ;;  %1605 = vmatmul.mubr.msk.f32.gmra.mrb[4].mxu0 %vm236_vm5, %v1599_v40  ;;  %v1416_v57 = vpop.permute.xlu1 %1415 }
  0xc2   : > { %1621 = vmatpush1.msk.msra.mxu1 %vm249_vm1, %v1824_v32  ;;  %703 = vmatprep.mubr.f32.mxu1 %v1716_v0  ;;  %v1559_v32 = vld [vmem:[%s2083_s1 + $0x70] sm:$0xff]  ;;  %v1411_v55 = vpop.permute.xlu0 %1410 }
  0xc3   : > { %1255 = vmatprep.mubr.f32.mxu0 %v1716_v0 }
  0xc5   : > { %1564 = vmatmul.mubr.msk.f32.gmra.mrb[2].mxu1 %vm236_vm5, %v1558_v41  ;;  %1606 = vmatmul.mubr.msk.f32.gmra.mrb[6].mxu0 %vm236_vm5, %v1600_v42  ;;  %v1421_v6 = vpop.permute.xlu1 %1420 }
  0xc6   : > { %709 = vmatprep.mubr.f32.mxu1 %v1716_v0  ;;  %1375 = vmatprep.mubr.f32.mxu0 %v1716_v0  ;;  %v1426_v27 = vpop.permute.xlu0 %1425 }
  0xc9   : > { %1565 = vmatmul.mubr.msk.f32.gmra.mrb[4].mxu1 %vm236_vm5, %v1559_v32  ;;  %1613 = vmatmul.mubr.msk.f32.vlgmr.msra.gmra.mrb[0].mxu0 %vm236_vm5, %v1607_v43 }
  0xca   : > { %715 = vmatprep.mubr.f32.mxu1 %v1716_v0  ;;  %1381 = vmatprep.mubr.f32.mxu0 %v1716_v0 }
  0xcd   : > { %1566 = vmatmul.mubr.msk.f32.gmra.mrb[6].mxu1 %vm236_vm5, %v1560_v44  ;;  %1614 = vmatmul.mubr.msk.f32.gmra.mrb[2].mxu0 %vm236_vm5, %v1608_v45 }
  0xce   : > { %841 = vmatprep.mubr.f32.mxu1 %v1716_v0  ;;  %1387 = vmatprep.mubr.f32.mxu0 %v1716_v0 }
  0xd1   : > { %1575 = vmatmul.mubr.msk.f32.vlgmr.msra.gmra.mrb[4].mxu1 %vm236_vm5, %v1569_v46  ;;  %1615 = vmatmul.mubr.msk.f32.gmra.mrb[4].mxu0 %vm236_vm5, %v1609_v47 }
  0xd2   : > { %847 = vmatprep.mubr.f32.mxu1 %v1716_v0  ;;  %1393 = vmatprep.mubr.f32.mxu0 %v1716_v0 }
  0xd5   : > { %1576 = vmatmul.mubr.msk.f32.gmra.mrb[6].mxu1 %vm236_vm5, %v1570_v48  ;;  %1616 = vmatmul.mubr.msk.f32.gmra.mrb[6].mxu0 %vm236_vm5, %v1610_v49 }
 0x194   : > { %v699_v50 = vpop.f32.mrb[0].mxu1 }
 0x195   : > { %v701_v51 = vpop.f32.mrb[1].mxu1 }
 0x198   : > { %v705_v52 = vpop.f32.mrb[2].mxu1 }
 0x199   : > { %v707_v53 = vpop.f32.mrb[3].mxu1 }
 0x19c   : > { %v1377_v54 = vpop.f32.mrb[0].mxu0 }
 0x19d   : > { %v1622_v56 = vadd.f32 %v1377_v54, %v699_v50  ;;  %v1379_v0 = vpop.f32.mrb[1].mxu0 }
 0x19e   : > { %v1623_v58 = vadd.f32 %v1379_v0, %v701_v51 }
 0x19f   : > { %v1428_v59 = vadd.f32 %v1622_v56, %v1411_v55 }
 0x1a0   : > { %v1429_v60 = vadd.f32 %v1623_v58, %v1411_v55  ;;  %v1383_v61 = vpop.f32.mrb[2].mxu0 }
 0x1a1   : > { %vm1436_vm14 = vcmp.ge.f32.partialorder %v1428_v59, 0.0  ;;  %v1444_v62 = vmul.f32 0.2, %v1428_v59  ;;  %v1624_v63 = vadd.f32 %v1383_v61, %v705_v52  ;;  %v1385_v1 = vpop.f32.mrb[3].mxu0 }
 0x1a2   : > { %vm1437_vm15 = vcmp.ge.f32.partialorder %v1429_v60, 0.0  ;;  %v1445_v2 = vmul.f32 0.2, %v1429_v60  ;;  %v1625_v3 = vadd.f32 %v1385_v1, %v707_v53 }
 0x1a3   : > { %v1452_v4 = vsel %vm1436_vm14, %v1428_v59, %v1444_v62  ;;  %v1430_v5 = vadd.f32 %v1624_v63, %v1416_v57 }
 0x1a4   : > { %v1453_v7 = vsel %vm1437_vm15, %v1429_v60, %v1445_v2  ;;  %1460 = vst [vmem:[%s2069_s7] sm:$0xff] %v1452_v4  ;;  %v1431_v8 = vadd.f32 %v1625_v3, %v1416_v57  ;;  %v843_v9 = vpop.f32.mrb[4].mxu1  ;;  %v1389_v10 = vpop.f32.mrb[4].mxu0 }
 0x1a5   : > { %1461 = vst [vmem:[%s2069_s7 + $0x8] sm:$0xff] %v1453_v7  ;;  %vm1438_vm0 = vcmp.ge.f32.partialorder %v1430_v5, 0.0  ;;  %v1446_v11 = vmul.f32 0.2, %v1430_v5  ;;  %v1626_v12 = vadd.f32 %v1389_v10, %v843_v9  ;;  %v845_v13 = vpop.f32.mrb[5].mxu1  ;;  %v1391_v14 = vpop.f32.mrb[5].mxu0 }
 0x1a6   : > { %vm1439_vm1 = vcmp.ge.f32.partialorder %v1431_v8, 0.0  ;;  %v1447_v15 = vmul.f32 0.2, %v1431_v8  ;;  %v1627_v16 = vadd.f32 %v1391_v14, %v845_v13 }
 0x1a7   : > { %v1454_v17 = vsel %vm1438_vm0, %v1430_v5, %v1446_v11  ;;  %v1432_v18 = vadd.f32 %v1626_v12, %v1421_v6 }
 0x1a8   : > { %v1455_v19 = vsel %vm1439_vm1, %v1431_v8, %v1447_v15  ;;  %1462 = vst [vmem:[%s2069_s7 + $0x10] sm:$0xff] %v1454_v17  ;;  %v1433_v20 = vadd.f32 %v1627_v16, %v1421_v6  ;;  %v849_v21 = vpop.f32.mrb[6].mxu1  ;;  %v1395_v22 = vpop.f32.mrb[6].mxu0 }
 0x1a9   : > { %1463 = vst [vmem:[%s2069_s7 + $0x18] sm:$0xff] %v1455_v19  ;;  %vm1440_vm2 = vcmp.ge.f32.partialorder %v1432_v18, 0.0  ;;  %v1448_v24 = vmul.f32 0.2, %v1432_v18  ;;  %v1628_v25 = vadd.f32 %v1395_v22, %v849_v21  ;;  %v851_v26 = vpop.f32.mrb[7].mxu1  ;;  %v1397_v28 = vpop.f32.mrb[7].mxu0 }
 0x1aa   : > { %vm1441_vm3 = vcmp.ge.f32.partialorder %v1433_v20, 0.0  ;;  %v1449_v29 = vmul.f32 0.2, %v1433_v20  ;;  %v1629_v30 = vadd.f32 %v1397_v28, %v851_v26 }
 0x1ab   : > { %v1456_v31 = vsel %vm1440_vm2, %v1432_v18, %v1448_v24  ;;  %v1434_v33 = vadd.f32 %v1628_v25, %v1426_v27 }
 0x1ac   : > { %v1457_v34 = vsel %vm1441_vm3, %v1433_v20, %v1449_v29  ;;  %1464 = vst [vmem:[%s2069_s7 + $0x20] sm:$0xff] %v1456_v31  ;;  %v1435_v23 = vadd.f32 %v1629_v30, %v1426_v27 }
 0x1ad   : > { %1465 = vst [vmem:[%s2069_s7 + $0x28] sm:$0xff] %v1457_v34  ;;  %vm1442_vm4 = vcmp.ge.f32.partialorder %v1434_v33, 0.0  ;;  %v1450_v35 = vmul.f32 0.2, %v1434_v33 }
 0x1ae   : > { %vm1443_vm5 = vcmp.ge.f32.partialorder %v1435_v23, 0.0  ;;  %v1451_v36 = vmul.f32 0.2, %v1435_v23 }
 0x1af   : > { %v1458_v37 = vsel %vm1442_vm4, %v1434_v33, %v1450_v35 }
 0x1b0   : > { %v1459_v38 = vsel %vm1443_vm5, %v1435_v23, %v1451_v36  ;;  %1466 = vst [vmem:[%s2069_s7 + $0x30] sm:$0xff] %v1458_v37 }
 0x1b1   : > { %1467 = vst [vmem:[%s2069_s7 + $0x38] sm:$0xff] %v1459_v38 }
 0x1b2 PF: > { %s13_s12 = sadd.s32 1, %s1714_s12  }
 0x1b3   : > { %p10_p4 = scmp.ge.s32.totalorder %s13_s12, 4  }
 0x1b5   :  { %12 = sbr.rel (!%p10_p4) target bundleno = 1 (0x1), region = 70 }

</bundles_post_ra>
